<compile_context>
chip_gen: v5e
topology: v5e:2x2
jax: 0.10.0
libtpu: 0.0.40
codegen_flags: <defaults>
</compile_context>

<pallas_src>
import functools

import jax
import jax.numpy as jnp
from jax import lax
from jax.experimental import pallas as pl
from jax.experimental.pallas import tpu as pltpu


def _reduce_sum_kernel(x_ref, o_ref, *, C, TC):
    # x_ref: (TR, TC) f32 input tile; o_ref: (TR, 1) f32 accumulator tile
    # (resident across the k / column grid axis).
    k = pl.program_id(1)

    x = x_ref[...]

    # Mask padded lanes of the last (partial) column tile. Static (trace-time)
    # check: this code is only emitted when C is not a multiple of TC.
    if C % TC != 0:
        lane = lax.broadcasted_iota(jnp.int32, x.shape, dimension=1)
        remaining = C - k * TC  # >= TC for all but the last column tile
        x = jnp.where(lane < remaining, x, jnp.zeros_like(x))

    partial = jnp.sum(x, axis=1, keepdims=True)  # (TR, 1) f32

    @pl.when(k == 0)
    def _():
        o_ref[...] = jnp.zeros_like(o_ref)

    o_ref[...] += partial


def reduce_sum_axis1(x: jax.Array, *, tc_max: int = 4096,
                     tr_max: int | None = None) -> jax.Array:
    """Equivalent of torch.sum(x, 1) for a rank-2 f32 array.

    tc_max / tr_max exist so tests can force the tiled / masked paths with
    small inputs; defaults target ~8 MiB input tiles.
    """
    assert x.ndim == 2, "net_ReduceSum (R2_d1) expects a rank-2 input"
    R, C = x.shape

    # --- Column tile: full extent if it fits, else a multiple of 128. ---
    assert tc_max % 128 == 0
    TC = C if C <= tc_max else tc_max

    # --- Row tile: size so the input tile is ~8 MiB, multiple of 8 if tiled. ---
    bytes_per_row = TC * x.dtype.itemsize
    budget_rows = max(8, (8 * 1024 * 1024) // max(bytes_per_row, 1))
    budget_rows = (budget_rows // 8) * 8
    if tr_max is not None:
        budget_rows = min(budget_rows, max(8, (tr_max // 8) * 8))
    TR = R if R <= budget_rows else budget_rows

    grid = (pl.cdiv(R, TR), pl.cdiv(C, TC))

    kernel = functools.partial(_reduce_sum_kernel, C=C, TC=TC)

    out2d = pl.pallas_call(
        kernel,
        out_shape=jax.ShapeDtypeStruct((R, 1), x.dtype),
        grid=grid,
        in_specs=[pl.BlockSpec((TR, TC), lambda i, k: (i, k))],
        out_specs=pl.BlockSpec((TR, 1), lambda i, k: (i, 0)),
        compiler_params=pltpu.CompilerParams(
            # Rows are independent (megacore-shardable on v7x); the column
            # axis is the reduction and must stay sequential.
            dimension_semantics=("parallel", "arbitrary"),
            vmem_limit_bytes=32 * 1024 * 1024,
        ),
        cost_estimate=pl.CostEstimate(
            flops=R * C,
            transcendentals=0,
            bytes_accessed=(R * C + R) * x.dtype.itemsize,
        ),
    )(x)

    # torch.sum(input, 1) drops the reduced dim -> shape (R,)
    return out2d.reshape(R)


if __name__ == "__main__":
    key = jax.random.PRNGKey(0)

    # Small rank-2 input consistent with ReduceSum_F32_R2_d1.
    x = jax.random.normal(key, (8, 32), dtype=jnp.float32)
    y = reduce_sum_axis1(x)
    jax.block_until_ready(y)
    y_ref = jnp.sum(x, axis=1)
    assert y.shape == y_ref.shape == (8,)
    assert jnp.allclose(y, y_ref, atol=1e-4, rtol=1e-5)

    # Second (still small) check that forces the multi-tile accumulator path
    # and the partial-column-tile masking: C=320 with TC=128 -> last column
    # tile has only 64 valid lanes; R=16 with TR=8 -> 2 row tiles.
    key2 = jax.random.PRNGKey(0)
    x2 = jax.random.normal(key2, (16, 320), dtype=jnp.float32)
    y2 = reduce_sum_axis1(x2, tc_max=128, tr_max=8)
    jax.block_until_ready(y2)
    y2_ref = jnp.sum(x2, axis=1)
    assert y2.shape == y2_ref.shape == (16,)
    assert jnp.allclose(y2, y2_ref, atol=1e-3, rtol=1e-5)

    print("KERNEL_OK")
</pallas_src>

<mosaic_0001>
module attributes {stable_mosaic.version = 11 : i64} {
  func.func @_reduce_sum_kernel(%arg0: i32, %arg1: i32, %arg2: memref<8x32xf32, #tpu.memory_space<vmem>>, %arg3: memref<8x1xf32, #tpu.memory_space<vmem>>) attributes {dimension_semantics = [#tpu.dimension_semantics<parallel>, #tpu.dimension_semantics<arbitrary>], iteration_bounds = array<i64: 1, 1>, scalar_prefetch = 0 : i64, scratch_operands = 0 : i64, tpu.core_type = #tpu.core_type<tc>, window_params = [{transform_indices = @transform_0, window_bounds = array<i64: 8, 32>}, {transform_indices = @transform_1, window_bounds = array<i64: 8, 1>}]} {
    %c0 = arith.constant 0 : index
    %c0_0 = arith.constant 0 : index
    %0 = vector.load %arg2[%c0, %c0_0] : memref<8x32xf32, #tpu.memory_space<vmem>>, vector<8x32xf32>
    %cst = arith.constant dense<0.000000e+00> : vector<8xf32>
    %1 = vector.multi_reduction <add>, %0, %cst [1] : vector<8x32xf32> to vector<8xf32>
    %2 = vector.shape_cast %1 : vector<8xf32> to vector<8x1xf32>
    %c0_i32 = arith.constant 0 : i32
    %3 = arith.cmpi eq, %arg1, %c0_i32 : i32
    %4 = arith.extui %3 : i1 to i32
    %c0_i32_1 = arith.constant 0 : i32
    %5 = arith.cmpi ne, %4, %c0_i32_1 : i32
    scf.if %5 {
      %cst_6 = arith.constant 0.000000e+00 : f32
      %9 = vector.broadcast %cst_6 : f32 to vector<8x1xf32>
      %c0_7 = arith.constant 0 : index
      %c0_8 = arith.constant 0 : index
      %10 = vector.load %arg3[%c0_7, %c0_8] : memref<8x1xf32, #tpu.memory_space<vmem>>, vector<8x1xf32>
      tpu.vector_store %arg3[%c0_7, %c0_8], %9 {strides = array<i32>} : memref<8x1xf32, #tpu.memory_space<vmem>>, vector<8x1xf32>,
    } else {
    }
    %c0_2 = arith.constant 0 : index
    %c0_3 = arith.constant 0 : index
    %6 = vector.load %arg3[%c0_2, %c0_3] : memref<8x1xf32, #tpu.memory_space<vmem>>, vector<8x1xf32>
    %7 = arith.addf %6, %2 : vector<8x1xf32>
    %c0_4 = arith.constant 0 : index
    %c0_5 = arith.constant 0 : index
    %8 = vector.load %arg3[%c0_4, %c0_5] : memref<8x1xf32, #tpu.memory_space<vmem>>, vector<8x1xf32>
    tpu.vector_store %arg3[%c0_4, %c0_5], %7 {strides = array<i32>} : memref<8x1xf32, #tpu.memory_space<vmem>>, vector<8x1xf32>,
    return
  }
  func.func @transform_0(%arg0: i32, %arg1: i32) -> (i32, i32) {
    %c0_i32 = arith.constant 0 : i32
    return %arg0, %arg1 : i32, i32
  }
  func.func @transform_1(%arg0: i32, %arg1: i32) -> (i32, i32) {
    %c0_i32 = arith.constant 0 : i32
    %c0_i32_0 = arith.constant 0 : i32
    return %arg0, %c0_i32 : i32, i32
  }
}

</mosaic_0001>

<bundles_post_ra>
// kernel: tpu_custom_call.1
= control target key start
LH: loop header
LB: loop body
LE: loop exit
PB: predicated region body
PF: predicated region fallthrough
CT: control target
= control target key end

     0   :  { %6 = vsyncpa [#allocation3], 0  ;;  %s70_s9 = smov [#allocation2]   ;;  %s94_s0 = inlined_call_operand.hbm [shape: f32[8,32], index: 0, kind: input, shape index: {}]   ;;  %s95_s1 = inlined_call_operand.vmem [shape: f32[8,1], index: 1, kind: output, shape index: {}]  }
   0x1   :  { %s12_s8 = sshll.u32 %s94_s0, 4  ;;  %s14_s10 = sshll.u32 %s70_s9, 4  ;;  %s13_s8 = int_to_ptr.hbm [resolvable:$true] %s12_s8  ;;  %s15_s10 = int_to_ptr.vmem [resolvable:$true] %s14_s10 }
   0x2   :  { %17 = dma.hbm_to_vmem [thread:$0]  %s13_s8, 128, %s15_s10, [#allocation3]  }
   0x3   :  { %68 = dma.done.wait [#allocation3], 128  }
   0x4   :  { %69 = vsyncadd [#allocation3], 4294967168  ;;  %vm31_vm0 = vcmask 7168   ;;  %v71_v0 = vmov 0.0   ;;  %vm23_vm1 = vcmask 261120   ;;  %v22_v1 = vld [vmem:[#allocation2] sm:$0xff] }
   0x5   :  { %32 = vst.msk [vmem:[%s95_s1] sm:$0xff] %vm31_vm0, %v71_v0  ;;  %v24_v2 = vsel %vm23_vm1, %v22_v1, 0.0 }
   0x6   :  { %25 = vadd.xlane.f32.xlu0 %v24_v2 }
   0xc   :  { %v33_v3 = vld [vmem:[%s95_s1] sm:$0xff] }
  0x79   :  { %v26_v4 = vpop.xlane.xlu0 %25 }
  0x7a   :  { %v34_v5 = vadd.f32 %v33_v3, %v26_v4 }
  0x7c   :  { %36 = vst.msk [vmem:[%s95_s1] sm:$0xff] %vm31_vm0, %v34_v5 }
  0x7d   :  { %41 = vsyncpa [#allocation3], 1 }

</bundles_post_ra>
